<compile_context>
chip_gen: v7x
topology: tpu7x:2x2x1
jax: 0.10.0
libtpu: 0.0.40
codegen_flags: <defaults>
</compile_context>

<pallas_src>
import functools

import jax
import jax.numpy as jnp
import numpy as np
from jax.experimental import pallas as pl
from jax.experimental.pallas import tpu as pltpu


def _round_up(x, m):
    return ((x + m - 1) // m) * m


def _cdiv(a, b):
    return -(-a // b)


def _leaky_relu(x, slope=0.2):
    return jnp.where(x > 0, x, slope * x)


def generator_kernel(x_ref,
                     w1_ref, b1_ref,
                     w2_ref, b2_ref,
                     w3_ref, b3_ref,
                     w4_ref, b4_ref,
                     out_ref):
    # fc1: single lane-dense dot (concat + K-pad folded in by the wrapper).
    h = jnp.dot(x_ref[...], w1_ref[...], preferred_element_type=jnp.float32)
    h = _leaky_relu(h.astype(jnp.bfloat16) + b1_ref[...])       # bf16 epilogue
    # fc2 + LeakyReLU(0.2)
    h = jnp.dot(h, w2_ref[...], preferred_element_type=jnp.float32)
    h = _leaky_relu(h.astype(jnp.bfloat16) + b2_ref[...])
    # fc3 + LeakyReLU(0.2)
    h = jnp.dot(h, w3_ref[...], preferred_element_type=jnp.float32)
    h = _leaky_relu(h.astype(jnp.bfloat16) + b3_ref[...])
    # fc4 + Tanh (f32 bias/tanh on the last 128-lane layer, bf16 store).
    h = jnp.dot(h, w4_ref[...], preferred_element_type=jnp.float32)
    out_ref[...] = jnp.tanh(h + b4_ref[...]).astype(out_ref.dtype)


@functools.partial(jax.jit, static_argnames=("img_shape",))
def generator_forward(noise, label, params, img_shape):
    B = noise.shape[0]
    p = params
    k_pad = p["w1"].shape[0]            # lane-padded fc1 input width (mult. of 128)
    n4_pad = p["w4"].shape[1]           # lane-padded output width (mult. of 128)

    # torch.cat((label, noise), -1) folded into one bf16, lane-dense input slab.
    x = jnp.concatenate([label, noise], axis=-1).astype(jnp.bfloat16)
    x = jnp.pad(x, ((0, 0), (0, k_pad - x.shape[1])))

    # Balanced batch tiling: <=512 rows/tile, >=2 tiles when B is large enough
    # (keeps both v7x TensorCores busy), TB a multiple of 16 (bf16 sublanes).
    max_tb = 512
    n_tiles = max(_cdiv(B, max_tb), 2 if B >= 32 else 1)
    TB = _round_up(_cdiv(B, n_tiles), 16)
    B_pad = TB * n_tiles
    if B_pad != B:
        x = jnp.pad(x, ((0, B_pad - B), (0, 0)))

    resident = lambda a: pl.BlockSpec(a.shape, lambda i: (0, 0))  # VMEM-resident

    out = pl.pallas_call(
        generator_kernel,
        out_shape=jax.ShapeDtypeStruct((B_pad, n4_pad), jnp.bfloat16),
        grid_spec=pltpu.PrefetchScalarGridSpec(
            num_scalar_prefetch=0,
            grid=(n_tiles,),
            in_specs=[
                pl.BlockSpec((TB, k_pad), lambda i: (i, 0)),      # input tile
                resident(p["w1"]), resident(p["b1"]),
                resident(p["w2"]), resident(p["b2"]),
                resident(p["w3"]), resident(p["b3"]),
                resident(p["w4"]), resident(p["b4"]),
            ],
            out_specs=pl.BlockSpec((TB, n4_pad), lambda i: (i, 0)),
        ),
        compiler_params=pltpu.CompilerParams(
            dimension_semantics=("parallel",),      # megacore sharding on v7x
            vmem_limit_bytes=32 * 1024 * 1024,
        ),
    )(x,
      p["w1"], p["b1"],
      p["w2"], p["b2"],
      p["w3"], p["b3"],
      p["w4"], p["b4"])

    # Strip batch/lane padding, upcast; matches torch: out.view(B, 1, img_shape)
    return out[:B, :img_shape].astype(jnp.float32).reshape(B, 1, img_shape)


def init_params(key, in_dim, img_shape):
    """Deterministic init mimicking nn.Linear's default U(-1/sqrt(fan_in), +).
    Weights stored as (in_features, out_features); biases as (1, out_features)."""
    dims = [(in_dim, 128), (128, 256), (256, 512), (512, img_shape)]
    params = {}
    for i, (fan_in, fan_out) in enumerate(dims, start=1):
        key, kw, kb = jax.random.split(key, 3)
        bound = 1.0 / np.sqrt(fan_in)
        params[f"w{i}"] = jax.random.uniform(
            kw, (fan_in, fan_out), jnp.float32, minval=-bound, maxval=bound)
        params[f"b{i}"] = jax.random.uniform(
            kb, (1, fan_out), jnp.float32, minval=-bound, maxval=bound)
    return params


def prepare_params(params, n_classes, latent_dim, img_shape):
    """Kernel-ready params: bf16 weights, fc1 rows padded to a multiple of 128
    (matching the lane-padded concat input), last layer's output columns padded
    to a multiple of 128 for a lane-dense store.  b1..b3 bf16 (bf16 epilogue),
    b4 stays f32 (added to the f32 accumulator before tanh)."""
    in_dim = latent_dim + n_classes
    k_pad = _round_up(in_dim, 128)
    n4_pad = _round_up(img_shape, 128)
    w1 = jnp.pad(params["w1"], ((0, k_pad - in_dim), (0, 0)))
    w4 = jnp.pad(params["w4"], ((0, 0), (0, n4_pad - img_shape)))
    b4 = jnp.pad(params["b4"], ((0, 0), (0, n4_pad - img_shape)))
    return {
        "w1": w1.astype(jnp.bfloat16), "b1": params["b1"].astype(jnp.bfloat16),
        "w2": params["w2"].astype(jnp.bfloat16), "b2": params["b2"].astype(jnp.bfloat16),
        "w3": params["w3"].astype(jnp.bfloat16), "b3": params["b3"].astype(jnp.bfloat16),
        "w4": w4.astype(jnp.bfloat16), "b4": b4,
    }
    # TODO(synk): weights are bf16-quantized; exact f32 torch parity would need
    # f32 weights (and ~2x weight DMA / MXU time).


def generator_reference(noise, label, kparams, img_shape):
    """Pure-JAX reference with the same (bf16) numerics as the kernel."""
    x = jnp.concatenate([label, noise], axis=-1).astype(jnp.bfloat16)
    x = jnp.pad(x, ((0, 0), (0, kparams["w1"].shape[0] - x.shape[1])))
    h = jnp.dot(x, kparams["w1"], preferred_element_type=jnp.float32)
    h = _leaky_relu(h.astype(jnp.bfloat16) + kparams["b1"])
    for i in (2, 3):
        h = jnp.dot(h, kparams[f"w{i}"], preferred_element_type=jnp.float32)
        h = _leaky_relu(h.astype(jnp.bfloat16) + kparams[f"b{i}"])
    h = jnp.dot(h, kparams["w4"], preferred_element_type=jnp.float32)
    h = jnp.tanh(h + kparams["b4"]).astype(jnp.bfloat16)
    B = noise.shape[0]
    return h[:, :img_shape].astype(jnp.float32).reshape(B, 1, img_shape)


if __name__ == "__main__":
    config = {"latent_dim": 32, "n_classes": 8, "img_shape": 64}
    B = 8
    in_dim = config["latent_dim"] + config["n_classes"]

    key = jax.random.PRNGKey(0)
    k_noise, k_label, k_params = jax.random.split(key, 3)

    noise = jax.random.normal(k_noise, (B, config["latent_dim"]), jnp.float32)
    label_idx = jax.random.randint(k_label, (B,), 0, config["n_classes"])
    label = jax.nn.one_hot(label_idx, config["n_classes"], dtype=jnp.float32)

    params = init_params(k_params, in_dim, config["img_shape"])
    kparams = prepare_params(params, config["n_classes"], config["latent_dim"],
                             config["img_shape"])

    out = generator_forward(noise, label, kparams, config["img_shape"])
    out = jax.block_until_ready(out)

    assert out.shape == (B, 1, config["img_shape"])
    assert bool(jnp.all(jnp.isfinite(out)))
    assert bool(jnp.all(jnp.abs(out) <= 1.0))  # tanh output range

    ref = generator_reference(noise, label, kparams, config["img_shape"])
    assert bool(jnp.max(jnp.abs(out - ref)) < 2e-2)

    print("KERNEL_OK")
</pallas_src>

<mosaic_0001>
module attributes {stable_mosaic.version = 11 : i64} {
  func.func @generator_kernel(%arg0: i32, %arg1: memref<16x128xbf16, #tpu.memory_space<vmem>>, %arg2: memref<128x128xbf16, #tpu.memory_space<vmem>>, %arg3: memref<1x128xbf16, #tpu.memory_space<vmem>>, %arg4: memref<128x256xbf16, #tpu.memory_space<vmem>>, %arg5: memref<1x256xbf16, #tpu.memory_space<vmem>>, %arg6: memref<256x512xbf16, #tpu.memory_space<vmem>>, %arg7: memref<1x512xbf16, #tpu.memory_space<vmem>>, %arg8: memref<512x128xbf16, #tpu.memory_space<vmem>>, %arg9: memref<1x128xf32, #tpu.memory_space<vmem>>, %arg10: memref<16x128xbf16, #tpu.memory_space<vmem>>) attributes {dimension_semantics = [#tpu.dimension_semantics<parallel>], iteration_bounds = array<i64: 1>, scalar_prefetch = 0 : i64, scratch_operands = 0 : i64, tpu.core_type = #tpu.core_type<tc>, window_params = [{transform_indices = @transform_0, window_bounds = array<i64: 16, 128>}, {pipeline_mode = #tpu.pipeline_mode<synchronous>, transform_indices = @transform_1, window_bounds = array<i64: 128, 128>}, {pipeline_mode = #tpu.pipeline_mode<synchronous>, transform_indices = @transform_2, window_bounds = array<i64: 1, 128>}, {pipeline_mode = #tpu.pipeline_mode<synchronous>, transform_indices = @transform_3, window_bounds = array<i64: 128, 256>}, {pipeline_mode = #tpu.pipeline_mode<synchronous>, transform_indices = @transform_4, window_bounds = array<i64: 1, 256>}, {pipeline_mode = #tpu.pipeline_mode<synchronous>, transform_indices = @transform_5, window_bounds = array<i64: 256, 512>}, {pipeline_mode = #tpu.pipeline_mode<synchronous>, transform_indices = @transform_6, window_bounds = array<i64: 1, 512>}, {pipeline_mode = #tpu.pipeline_mode<synchronous>, transform_indices = @transform_7, window_bounds = array<i64: 512, 128>}, {pipeline_mode = #tpu.pipeline_mode<synchronous>, transform_indices = @transform_8, window_bounds = array<i64: 1, 128>}, {transform_indices = @transform_9, window_bounds = array<i64: 16, 128>}]} {
    %c0 = arith.constant 0 : index
    %c0_0 = arith.constant 0 : index
    %0 = vector.load %arg1[%c0, %c0_0] : memref<16x128xbf16, #tpu.memory_space<vmem>>, vector<16x128xbf16>
    %c0_1 = arith.constant 0 : index
    %c0_2 = arith.constant 0 : index
    %1 = vector.load %arg2[%c0_1, %c0_2] : memref<128x128xbf16, #tpu.memory_space<vmem>>, vector<128x128xbf16>
    %cst = arith.constant dense<0.000000e+00> : vector<16x128xf32>
    %2 = tpu.matmul %0, %1, %cst {dimension_numbers = #tpu.dot_dimension_numbers<[1], [0], [0], [1], [0, 0, 1, 1], [], []>} : vector<16x128xbf16>, vector<128x128xbf16>, vector<16x128xf32> -> vector<16x128xf32>
    %3 = arith.truncf %2 : vector<16x128xf32> to vector<16x128xbf16>
    %c0_3 = arith.constant 0 : index
    %c0_4 = arith.constant 0 : index
    %4 = vector.load %arg3[%c0_3, %c0_4] : memref<1x128xbf16, #tpu.memory_space<vmem>>, vector<1x128xbf16>
    %5 = vector.broadcast %4 : vector<1x128xbf16> to vector<16x128xbf16>
    %6 = arith.addf %3, %5 : vector<16x128xbf16>
    %cst_5 = arith.constant 0.000000e+00 : bf16
    %7 = vector.broadcast %cst_5 : bf16 to vector<16x128xbf16>
    %8 = arith.cmpf ogt, %6, %7 : vector<16x128xbf16>
    %cst_6 = arith.constant 2.001950e-01 : bf16
    %9 = vector.broadcast %cst_6 : bf16 to vector<16x128xbf16>
    %10 = arith.mulf %9, %6 : vector<16x128xbf16>
    %11 = arith.select %8, %6, %10 : vector<16x128xi1>, vector<16x128xbf16>
    %c0_7 = arith.constant 0 : index
    %c0_8 = arith.constant 0 : index
    %12 = vector.load %arg4[%c0_7, %c0_8] : memref<128x256xbf16, #tpu.memory_space<vmem>>, vector<128x256xbf16>
    %cst_9 = arith.constant dense<0.000000e+00> : vector<16x256xf32>
    %13 = tpu.matmul %11, %12, %cst_9 {dimension_numbers = #tpu.dot_dimension_numbers<[1], [0], [0], [1], [0, 0, 1, 1], [], []>} : vector<16x128xbf16>, vector<128x256xbf16>, vector<16x256xf32> -> vector<16x256xf32>
    %14 = arith.truncf %13 : vector<16x256xf32> to vector<16x256xbf16>
    %c0_10 = arith.constant 0 : index
    %c0_11 = arith.constant 0 : index
    %15 = vector.load %arg5[%c0_10, %c0_11] : memref<1x256xbf16, #tpu.memory_space<vmem>>, vector<1x256xbf16>
    %16 = vector.broadcast %15 : vector<1x256xbf16> to vector<16x256xbf16>
    %17 = arith.addf %14, %16 : vector<16x256xbf16>
    %cst_12 = arith.constant 0.000000e+00 : bf16
    %18 = vector.broadcast %cst_12 : bf16 to vector<16x256xbf16>
    %19 = arith.cmpf ogt, %17, %18 : vector<16x256xbf16>
    %cst_13 = arith.constant 2.001950e-01 : bf16
    %20 = vector.broadcast %cst_13 : bf16 to vector<16x256xbf16>
    %21 = arith.mulf %20, %17 : vector<16x256xbf16>
    %22 = arith.select %19, %17, %21 : vector<16x256xi1>, vector<16x256xbf16>
    %c0_14 = arith.constant 0 : index
    %c0_15 = arith.constant 0 : index
    %23 = vector.load %arg6[%c0_14, %c0_15] : memref<256x512xbf16, #tpu.memory_space<vmem>>, vector<256x512xbf16>
    %cst_16 = arith.constant dense<0.000000e+00> : vector<16x512xf32>
    %24 = tpu.matmul %22, %23, %cst_16 {dimension_numbers = #tpu.dot_dimension_numbers<[1], [0], [0], [1], [0, 0, 1, 1], [], []>} : vector<16x256xbf16>, vector<256x512xbf16>, vector<16x512xf32> -> vector<16x512xf32>
    %25 = arith.truncf %24 : vector<16x512xf32> to vector<16x512xbf16>
    %c0_17 = arith.constant 0 : index
    %c0_18 = arith.constant 0 : index
    %26 = vector.load %arg7[%c0_17, %c0_18] : memref<1x512xbf16, #tpu.memory_space<vmem>>, vector<1x512xbf16>
    %27 = vector.broadcast %26 : vector<1x512xbf16> to vector<16x512xbf16>
    %28 = arith.addf %25, %27 : vector<16x512xbf16>
    %cst_19 = arith.constant 0.000000e+00 : bf16
    %29 = vector.broadcast %cst_19 : bf16 to vector<16x512xbf16>
    %30 = arith.cmpf ogt, %28, %29 : vector<16x512xbf16>
    %cst_20 = arith.constant 2.001950e-01 : bf16
    %31 = vector.broadcast %cst_20 : bf16 to vector<16x512xbf16>
    %32 = arith.mulf %31, %28 : vector<16x512xbf16>
    %33 = arith.select %30, %28, %32 : vector<16x512xi1>, vector<16x512xbf16>
    %c0_21 = arith.constant 0 : index
    %c0_22 = arith.constant 0 : index
    %34 = vector.load %arg8[%c0_21, %c0_22] : memref<512x128xbf16, #tpu.memory_space<vmem>>, vector<512x128xbf16>
    %cst_23 = arith.constant dense<0.000000e+00> : vector<16x128xf32>
    %35 = tpu.matmul %33, %34, %cst_23 {dimension_numbers = #tpu.dot_dimension_numbers<[1], [0], [0], [1], [0, 0, 1, 1], [], []>} : vector<16x512xbf16>, vector<512x128xbf16>, vector<16x128xf32> -> vector<16x128xf32>
    %c0_24 = arith.constant 0 : index
    %c0_25 = arith.constant 0 : index
    %36 = vector.load %arg9[%c0_24, %c0_25] : memref<1x128xf32, #tpu.memory_space<vmem>>, vector<1x128xf32>
    %37 = vector.broadcast %36 : vector<1x128xf32> to vector<16x128xf32>
    %38 = arith.addf %35, %37 : vector<16x128xf32>
    %39 = math.tanh %38 : vector<16x128xf32>
    %40 = arith.truncf %39 : vector<16x128xf32> to vector<16x128xbf16>
    %c0_26 = arith.constant 0 : index
    %c0_27 = arith.constant 0 : index
    %41 = vector.load %arg10[%c0_26, %c0_27] : memref<16x128xbf16, #tpu.memory_space<vmem>>, vector<16x128xbf16>
    tpu.vector_store %arg10[%c0_26, %c0_27], %40 {strides = array<i32>} : memref<16x128xbf16, #tpu.memory_space<vmem>>, vector<16x128xbf16>,
    return
  }
  func.func @transform_0(%arg0: i32) -> (i32, i32) {
    %c0_i32 = arith.constant 0 : i32
    %c0_i32_0 = arith.constant 0 : i32
    return %arg0, %c0_i32 : i32, i32
  }
  func.func @transform_1(%arg0: i32) -> (i32, i32) {
    %c0_i32 = arith.constant 0 : i32
    %c0_i32_0 = arith.constant 0 : i32
    %c0_i32_1 = arith.constant 0 : i32
    return %c0_i32, %c0_i32_0 : i32, i32
  }
  func.func @transform_2(%arg0: i32) -> (i32, i32) {
    %c0_i32 = arith.constant 0 : i32
    %c0_i32_0 = arith.constant 0 : i32
    %c0_i32_1 = arith.constant 0 : i32
    return %c0_i32, %c0_i32_0 : i32, i32
  }
  func.func @transform_3(%arg0: i32) -> (i32, i32) {
    %c0_i32 = arith.constant 0 : i32
    %c0_i32_0 = arith.constant 0 : i32
    %c0_i32_1 = arith.constant 0 : i32
    return %c0_i32, %c0_i32_0 : i32, i32
  }
  func.func @transform_4(%arg0: i32) -> (i32, i32) {
    %c0_i32 = arith.constant 0 : i32
    %c0_i32_0 = arith.constant 0 : i32
    %c0_i32_1 = arith.constant 0 : i32
    return %c0_i32, %c0_i32_0 : i32, i32
  }
  func.func @transform_5(%arg0: i32) -> (i32, i32) {
    %c0_i32 = arith.constant 0 : i32
    %c0_i32_0 = arith.constant 0 : i32
    %c0_i32_1 = arith.constant 0 : i32
    return %c0_i32, %c0_i32_0 : i32, i32
  }
  func.func @transform_6(%arg0: i32) -> (i32, i32) {
    %c0_i32 = arith.constant 0 : i32
    %c0_i32_0 = arith.constant 0 : i32
    %c0_i32_1 = arith.constant 0 : i32
    return %c0_i32, %c0_i32_0 : i32, i32
  }
  func.func @transform_7(%arg0: i32) -> (i32, i32) {
    %c0_i32 = arith.constant 0 : i32
    %c0_i32_0 = arith.constant 0 : i32
    %c0_i32_1 = arith.constant 0 : i32
    return %c0_i32, %c0_i32_0 : i32, i32
  }
  func.func @transform_8(%arg0: i32) -> (i32, i32) {
    %c0_i32 = arith.constant 0 : i32
    %c0_i32_0 = arith.constant 0 : i32
    %c0_i32_1 = arith.constant 0 : i32
    return %c0_i32, %c0_i32_0 : i32, i32
  }
  func.func @transform_9(%arg0: i32) -> (i32, i32) {
    %c0_i32 = arith.constant 0 : i32
    %c0_i32_0 = arith.constant 0 : i32
    return %arg0, %c0_i32 : i32, i32
  }
}

</mosaic_0001>

<bundles_post_ra>
// kernel: generator_forward.1
= control target key start
LH: loop header
LB: loop body
LE: loop exit
PB: predicated region body
PF: predicated region fallthrough
CT: control target
= control target key end

     0   :  { %14 = vsyncpa [#allocation3], 0  ;;  %s1957_s0 = inlined_call_operand.vmem [shape: bf16[16,128], index: 0, kind: input, shape index: {}]   ;;  %s1958_s1 = inlined_call_operand.vmem [shape: bf16[128,128], index: 1, kind: input, shape index: {}]   ;;  %s1959_s2 = inlined_call_operand.vmem [shape: bf16[1,128], index: 2, kind: input, shape index: {}]   ;;  %s1960_s3 = inlined_call_operand.hbm [shape: bf16[128,256], index: 3, kind: input, shape index: {}]   ;;  %s1961_s4 = inlined_call_operand.vmem [shape: bf16[1,256], index: 4, kind: input, shape index: {}]   ;;  %s1962_s5 = inlined_call_operand.hbm [shape: bf16[256,512], index: 5, kind: input, shape index: {}]   ;;  %s1963_s6 = inlined_call_operand.vmem [shape: bf16[1,512], index: 6, kind: input, shape index: {}]   ;;  %s1964_s7 = inlined_call_operand.hbm [shape: bf16[512,128], index: 7, kind: input, shape index: {}]   ;;  %s1965_s8 = inlined_call_operand.hbm [shape: f32[1,128], index: 8, kind: input, shape index: {}]   ;;  %s1966_s9 = inlined_call_operand.vmem [shape: bf16[16,128], index: 9, kind: output, shape index: {}]  }
   0x1   :  { %15 = vsyncpa [#allocation5], 0 }
   0x2   :  { %16 = vsyncpa [#allocation8], 0  ;;  %s1787_s30 = smov [#allocation4]   ;;  %s1693_s13 = scalar_lea.hbm %s1962_s5, 8192 }
   0x3   :  { %s42_s10 = sshll.u32 %s1787_s30, 4  ;;  %p1694_p0 = scmp.ne.s32.totalorder %s1962_s5, %s1693_s13  ;;  %s43_s10 = int_to_ptr.vmem [resolvable:$true] %s42_s10 }
   0x4   :  { %p1697_p1 = scmp.lt.u32.totalorder %s1693_s13, %s1962_s5 }
   0x6   :  { %p1699_p2 = pnand %p1697_p1, %p1694_p0 }
   0x8   :  { %1702 = shalt.err (!%p1699_p2)
}
   0x9   :  { %s1703_s18 = scalar_lea.vmem %s43_s10, 8192  ;;  %p1708_p4 = scmp.lt.s32.totalorder %s43_s10, %s43_s10 }
   0xa   :  { %p1704_p3 = scmp.ne.s32.totalorder %s43_s10, %s1703_s18  ;;  %p1709_p5 = scmp.lt.s32.totalorder %s1703_s18, %s1703_s18 }
   0xc   :  { %p1710_p6 = por %p1709_p5, %p1708_p4 }
   0xe   :  { %p1711_p7 = pnand %p1710_p6, %p1704_p3 }
  0x10   :  { %1714 = shalt.err (!%p1711_p7)
}
  0x11   :  { %s1788_s19 = smov 256   ;;  %s1789_s20 = smov 16  }
  0x12   :  { %48 = dma.hbm_to_vmem [thread:$0]  %s1962_s5, 8192, %s43_s10, [#allocation5], %s1788_s19, %s1788_s19, %s1789_s20  }
  0x13   :  { %s1790_s23 = smov [#allocation2]   ;;  %s1715_s27 = scalar_lea.hbm %s1960_s3, 2048 }
  0x14   :  { %s28_s24 = sshll.u32 %s1790_s23, 4  ;;  %p1716_p8 = scmp.ne.s32.totalorder %s1960_s3, %s1715_s27  ;;  %s29_s24 = int_to_ptr.vmem [resolvable:$true] %s28_s24 }
  0x15   :  { %p1719_p9 = scmp.lt.u32.totalorder %s1715_s27, %s1960_s3 }
  0x17   :  { %p1721_p10 = pnand %p1719_p9, %p1716_p8 }
  0x19   :  { %1724 = shalt.err (!%p1721_p10)
}
  0x1a   :  { %s1725_s12 = scalar_lea.vmem %s29_s24, 2048  ;;  %p1730_p12 = scmp.lt.s32.totalorder %s29_s24, %s29_s24 }
  0x1b   :  { %p1726_p11 = scmp.ne.s32.totalorder %s29_s24, %s1725_s12  ;;  %p1731_p13 = scmp.lt.s32.totalorder %s1725_s12, %s1725_s12 }
  0x1d   :  { %p1732_p0 = por %p1731_p13, %p1730_p12 }
  0x1f   :  { %p1733_p1 = pnand %p1732_p0, %p1726_p11 }
  0x21   :  { %1736 = shalt.err (!%p1733_p1)
}
  0x22   :  { %s1791_s5 = smov 128   ;;  %s1792_s10 = smov 8  }
  0x23   :  { %34 = dma.hbm_to_vmem [thread:$0]  %s1960_s3, 2048, %s29_s24, [#allocation3], %s1791_s5, %s1791_s5, %s1792_s10  }
  0x24   :  { %s1793_s15 = smov [#allocation6]   ;;  %s1737_s19 = scalar_lea.hbm %s1964_s7, 4096 }
  0x25   :  { %s56_s16 = sshll.u32 %s1793_s15, 4  ;;  %p1738_p2 = scmp.ne.s32.totalorder %s1964_s7, %s1737_s19  ;;  %s57_s16 = int_to_ptr.vmem [resolvable:$true] %s56_s16 }
  0x26   :  { %p1741_p3 = scmp.lt.u32.totalorder %s1737_s19, %s1964_s7 }
  0x28   :  { %p1743_p4 = pnand %p1741_p3, %p1738_p2 }
  0x2a   :  { %1746 = shalt.err (!%p1743_p4)
}
  0x2b   :  { %s1747_s25 = scalar_lea.vmem %s57_s16, 4096  ;;  %p1752_p6 = scmp.lt.s32.totalorder %s57_s16, %s57_s16 }
  0x2c   :  { %p1748_p5 = scmp.ne.s32.totalorder %s57_s16, %s1747_s25  ;;  %p1753_p7 = scmp.lt.s32.totalorder %s1747_s25, %s1747_s25 }
  0x2e   :  { %p1754_p8 = por %p1753_p7, %p1752_p6 }
  0x30   :  { %p1755_p9 = pnand %p1754_p8, %p1748_p5 }
  0x32   :  { %1758 = shalt.err (!%p1755_p9)
}
  0x33   :  { %s1794_s3 = smov 64   ;;  %s1795_s24 = smov 4  }
  0x34   :  { %62 = dma.hbm_to_vmem [thread:$0]  %s1964_s7, 4096, %s57_s16, [#allocation5], %s1794_s3, %s1794_s3, %s1795_s24  }
  0x35   :  { %s1796_s28 = smov [#allocation7]   ;;  %s1759_s12 = scalar_lea.hbm %s1965_s8, 16 }
  0x36   :  { %s69_s29 = sshll.u32 %s1796_s28, 4  ;;  %p1760_p10 = scmp.ne.s32.totalorder %s1965_s8, %s1759_s12  ;;  %s70_s29 = int_to_ptr.vmem [resolvable:$true] %s69_s29 }
  0x37   :  { %p1763_p11 = scmp.lt.u32.totalorder %s1759_s12, %s1965_s8 }
  0x39   :  { %p1765_p12 = pnand %p1763_p11, %p1760_p10 }
  0x3b   :  { %1768 = shalt.err (!%p1765_p12)
}
  0x3c   :  { %s1769_s15 = scalar_lea.vmem %s70_s29, 16  ;;  %s1773_s7 = scalar_lea.vmem %s70_s29, 32 }
  0x3d   :  { %p1770_p13 = scmp.ne.s32.totalorder %s70_s29, %s1769_s15  ;;  %p1774_p0 = scmp.lt.s32.totalorder %s70_s29, %s70_s29 }
  0x3e   :  { %p1775_p1 = scmp.lt.s32.totalorder %s1773_s7, %s1769_s15 }
  0x40   :  { %p1776_p2 = por %p1775_p1, %p1774_p0 }
  0x42   :  { %p1777_p3 = pnand %p1776_p2, %p1770_p13 }
  0x44   :  { %1780 = shalt.err (!%p1777_p3)
}
  0x45   :  { %72 = dma.hbm_to_vmem [thread:$0]  %s1965_s8, 16, %s70_s29, [#allocation8]  }
  0x46   :  { %1781 = dma.done.wait [#allocation3], 2048  }
  0x47   :  { %1782 = vsyncadd [#allocation3], 4294965248 }
  0x48   :  { %1783 = dma.done.wait [#allocation5], 12288  }
  0x49   :  { %1784 = vsyncadd [#allocation5], 4294955008 }
  0x4a   :  { %1785 = dma.done.wait [#allocation8], 16  }
  0x4b   :  { %1786 = vsyncadd [#allocation8], 4294967280  ;;  %v1797_v0 = vmov 0.0   ;;  %vm1798_vm0 = vmmov 0   ;;  %v1528_v1 = vld [vmem:[%s1958_s1] sm:$0xff]   ;;  %v1529_v2 = vld [vmem:[%s1958_s1 + $0x8] sm:$0xff]   ;;  %v205_v54 = vlaneseq }
  0x4c   :  { %1494 = vmatprep.subr.bf16.mxu0 %v1797_v0  ;;  %1510 = vmatprep.mubr.msk.bf16.mxu0 %vm1798_vm0, %v1797_v0  ;;  %v1530_v3 = vld [vmem:[%s1958_s1 + $0x10] sm:$0xff]   ;;  %v1531_v4 = vld [vmem:[%s1958_s1 + $0x18] sm:$0xff]   ;;  %v1537_v5 = vld [vmem:[#allocation2 + $0x4] ss:$8 sps:$4 sm:$0xff]   ;;  %v1799_v26 = vmov 0  }
  0x4d   :  { %1495 = vmatpush3.bf16.msra.mxu0 %v1528_v1  ;;  %v1539_v6 = vld [vmem:[#allocation2] ss:$8 sps:$4 sm:$0xff]   ;;  %309 = vmatprep.subr.bf16.mxu1 %v1537_v5  ;;  %v1540_v7 = vld [vmem:[#allocation2 + $0x14] ss:$8 sps:$4 sm:$0xff]   ;;  %v1542_v8 = vld [vmem:[#allocation2 + $0x10] ss:$8 sps:$4 sm:$0xff]  }
  0x4e   :  { %1496 = vmatprep.subr.bf16.mxu0 %v1797_v0  ;;  %310 = vmatpush1.bf16.msra.mxu1 %v1539_v6  ;;  %v1543_v9 = vld [vmem:[#allocation2 + $0x24] ss:$8 sps:$4 sm:$0xff]   ;;  %v1545_v12 = vld [vmem:[#allocation2 + $0x20] ss:$8 sps:$4 sm:$0xff]   ;;  %v1546_v13 = vld [vmem:[#allocation2 + $0x34] ss:$8 sps:$4 sm:$0xff]  }
  0x4f   :  { %311 = vmatprep.subr.bf16.mxu1 %v1540_v7  ;;  %v1532_v10 = vld [vmem:[%s1958_s1 + $0x20] sm:$0xff]   ;;  %v1533_v11 = vld [vmem:[%s1958_s1 + $0x28] sm:$0xff]   ;;  %v1548_v14 = vld [vmem:[#allocation2 + $0x30] ss:$8 sps:$4 sm:$0xff]   ;;  %341 = vmatprep.mubr.bf16.mxu1 %v1799_v26  ;;  %v1926_v55 = vshrl.u32 %v205_v54, 7 }
  0x50   :  { %v1549_v15 = vld [vmem:[#allocation2 + $0x44] ss:$8 sps:$4 sm:$0xff]   ;;  %v1534_v16 = vld [vmem:[%s1958_s1 + $0x30] sm:$0xff]   ;;  %v1551_v17 = vld [vmem:[#allocation2 + $0x40] ss:$8 sps:$4 sm:$0xff]  }
  0x51   :  { %1497 = vmatpush3.bf16.msra.mxu0 %v1529_v2  ;;  %v1552_v18 = vld [vmem:[#allocation2 + $0x54] ss:$8 sps:$4 sm:$0xff]   ;;  %v1554_v20 = vld [vmem:[#allocation2 + $0x50] ss:$8 sps:$4 sm:$0xff]   ;;  %v1536_v21 = vld [vmem:[%s1957_s0] sm:$0xff]   ;;  %v1932_v58 = vsub.s32 0, %v1926_v55 }
  0x52   :  { %1498 = vmatprep.subr.bf16.mxu0 %v1797_v0  ;;  %312 = vmatpush1.bf16.msra.mxu1 %v1542_v8  ;;  %v1535_v19 = vld [vmem:[%s1958_s1 + $0x38] sm:$0xff]   ;;  %v1555_v22 = vld [vmem:[#allocation2 + $0x64] ss:$8 sps:$4 sm:$0xff]   ;;  %v1557_v23 = vld [vmem:[#allocation2 + $0x60] ss:$8 sps:$4 sm:$0xff]  }
  0x53   :  { %313 = vmatprep.subr.bf16.mxu1 %v1543_v9  ;;  %v1558_v24 = vld [vmem:[#allocation2 + $0x74] ss:$8 sps:$4 sm:$0xff]   ;;  %v1560_v25 = vld [vmem:[#allocation2 + $0x70] ss:$8 sps:$4 sm:$0xff]   ;;  %v201_v56 = vld [vmem:[%s1959_s2] sm:$0x1] }
  0x54   :  { %v1561_v27 = vld [vmem:[#allocation4] ss:$16 sps:$4 sm:$0xff]   ;;  %v1563_v28 = vld [vmem:[#allocation4 + $0x4] ss:$16 sps:$4 sm:$0xff]   ;;  %v1566_v29 = vld [vmem:[#allocation4 + $0xc] ss:$16 sps:$4 sm:$0xff]   ;;  %v203_v57 = vpack.i.b16 %v201_v56, %v201_v56 }
  0x55   :  { %1499 = vmatpush3.bf16.msra.mxu0 %v1530_v3  ;;  %v1569_v30 = vld [vmem:[#allocation4 + $0x24] ss:$16 sps:$4 sm:$0xff]   ;;  %v1567_v31 = vld [vmem:[#allocation4 + $0x20] ss:$16 sps:$4 sm:$0xff]   ;;  %v1564_v3 = vld [vmem:[#allocation4 + $0x8] ss:$16 sps:$4 sm:$0xff]  }
  0x56   :  { %1500 = vmatprep.subr.bf16.mxu0 %v1797_v0  ;;  %314 = vmatpush1.bf16.msra.mxu1 %v1545_v12  ;;  %v1575_v32 = vld [vmem:[#allocation4 + $0x44] ss:$16 sps:$4 sm:$0xff]   ;;  %v1573_v33 = vld [vmem:[#allocation4 + $0x40] ss:$16 sps:$4 sm:$0xff]   ;;  %v208_v61 = vrot.slane %v203_v57, %v1932_v58  ;;  %v1570_v6 = vld [vmem:[#allocation4 + $0x28] ss:$16 sps:$4 sm:$0xff]  }
  0x57   :  { %315 = vmatprep.subr.bf16.mxu1 %v1546_v13  ;;  %v1581_v34 = vld [vmem:[#allocation4 + $0x64] ss:$16 sps:$4 sm:$0xff]   ;;  %v1579_v35 = vld [vmem:[#allocation4 + $0x60] ss:$16 sps:$4 sm:$0xff]   ;;  %v1578_v7 = vld [vmem:[#allocation4 + $0x4c] ss:$16 sps:$4 sm:$0xff]  }
  0x58   :  { %v1587_v36 = vld [vmem:[#allocation4 + $0x84] ss:$16 sps:$4 sm:$0xff]   ;;  %v1585_v37 = vld [vmem:[#allocation4 + $0x80] ss:$16 sps:$4 sm:$0xff]   ;;  %v1576_v8 = vld [vmem:[#allocation4 + $0x48] ss:$16 sps:$4 sm:$0xff]  }
  0x59   :  { %1501 = vmatpush3.bf16.msra.mxu0 %v1531_v4  ;;  %v1593_v38 = vld [vmem:[#allocation4 + $0xa4] ss:$16 sps:$4 sm:$0xff]   ;;  %v1591_v39 = vld [vmem:[#allocation4 + $0xa0] ss:$16 sps:$4 sm:$0xff]   ;;  %v1572_v4 = vld [vmem:[#allocation4 + $0x2c] ss:$16 sps:$4 sm:$0xff]  }
  0x5a   :  { %1502 = vmatprep.subr.bf16.mxu0 %v1797_v0  ;;  %316 = vmatpush1.bf16.msra.mxu1 %v1548_v14  ;;  %v1599_v40 = vld [vmem:[#allocation4 + $0xc4] ss:$16 sps:$4 sm:$0xff]   ;;  %v1597_v41 = vld [vmem:[#allocation4 + $0xc0] ss:$16 sps:$4 sm:$0xff]   ;;  %v1584_v9 = vld [vmem:[#allocation4 + $0x6c] ss:$16 sps:$4 sm:$0xff]  }
  0x5b   :  { %317 = vmatprep.subr.bf16.mxu1 %v1549_v15  ;;  %v1605_v42 = vld [vmem:[#allocation4 + $0xe4] ss:$16 sps:$4 sm:$0xff]   ;;  %v1603_v43 = vld [vmem:[#allocation4 + $0xe0] ss:$16 sps:$4 sm:$0xff]   ;;  %v1588_v12 = vld [vmem:[#allocation4 + $0x88] ss:$16 sps:$4 sm:$0xff]  }
  0x5c   :  { %v1611_v44 = vld [vmem:[#allocation4 + $0x104] ss:$16 sps:$4 sm:$0xff]   ;;  %v1609_v45 = vld [vmem:[#allocation4 + $0x100] ss:$16 sps:$4 sm:$0xff]   ;;  %v1596_v13 = vld [vmem:[#allocation4 + $0xac] ss:$16 sps:$4 sm:$0xff]  }
  0x5d   :  { %1503 = vmatpush3.bf16.msra.mxu0 %v1532_v10  ;;  %v1617_v46 = vld [vmem:[#allocation4 + $0x124] ss:$16 sps:$4 sm:$0xff]   ;;  %v1615_v47 = vld [vmem:[#allocation4 + $0x120] ss:$16 sps:$4 sm:$0xff]   ;;  %v1582_v10 = vld [vmem:[#allocation4 + $0x68] ss:$16 sps:$4 sm:$0xff]  }
  0x5e   :  { %1504 = vmatprep.subr.bf16.mxu0 %v1797_v0  ;;  %318 = vmatpush1.bf16.msra.mxu1 %v1551_v17  ;;  %v1623_v48 = vld [vmem:[#allocation4 + $0x144] ss:$16 sps:$4 sm:$0xff]   ;;  %v1621_v49 = vld [vmem:[#allocation4 + $0x140] ss:$16 sps:$4 sm:$0xff]   ;;  %v1594_v14 = vld [vmem:[#allocation4 + $0xa8] ss:$16 sps:$4 sm:$0xff]  }
  0x5f   :  { %319 = vmatprep.subr.bf16.mxu1 %v1552_v18  ;;  %v1629_v50 = vld [vmem:[#allocation4 + $0x164] ss:$16 sps:$4 sm:$0xff]   ;;  %v1627_v51 = vld [vmem:[#allocation4 + $0x160] ss:$16 sps:$4 sm:$0xff]   ;;  %v1602_v15 = vld [vmem:[#allocation4 + $0xcc] ss:$16 sps:$4 sm:$0xff]  }
  0x60   :  { %v1635_v52 = vld [vmem:[#allocation4 + $0x184] ss:$16 sps:$4 sm:$0xff]   ;;  %v1633_v53 = vld [vmem:[#allocation4 + $0x180] ss:$16 sps:$4 sm:$0xff]   ;;  %v1608_v17 = vld [vmem:[#allocation4 + $0xec] ss:$16 sps:$4 sm:$0xff]  }
  0x61   :  { %1505 = vmatpush3.bf16.msra.mxu0 %v1533_v11  ;;  %v1590_v11 = vld [vmem:[#allocation4 + $0x8c] ss:$16 sps:$4 sm:$0xff]   ;;  %v1606_v18 = vld [vmem:[#allocation4 + $0xe8] ss:$16 sps:$4 sm:$0xff]  }
  0x62   :  { %1506 = vmatprep.subr.bf16.mxu0 %v1797_v0  ;;  %320 = vmatpush1.bf16.msra.mxu1 %v1554_v20  ;;  %v1612_v20 = vld [vmem:[#allocation4 + $0x108] ss:$16 sps:$4 sm:$0xff]  }
  0x63   :  { %321 = vmatprep.subr.bf16.mxu1 %v1555_v22  ;;  %v1618_v22 = vld [vmem:[#allocation4 + $0x128] ss:$16 sps:$4 sm:$0xff]  }
  0x64   :  { %v1630_v26 = vld [vmem:[#allocation4 + $0x168] ss:$16 sps:$4 sm:$0xff]  }
  0x65   :  { %1507 = vmatpush3.bf16.msra.mxu0 %v1534_v16  ;;  %v1600_v16 = vld [vmem:[#allocation4 + $0xc8] ss:$16 sps:$4 sm:$0xff]  }
  0x66   :  { %1508 = vmatprep.subr.bf16.mxu0 %v1797_v0  ;;  %322 = vmatpush1.bf16.msra.mxu1 %v1557_v23  ;;  %v1626_v23 = vld [vmem:[#allocation4 + $0x14c] ss:$16 sps:$4 sm:$0xff]  }
  0x67   :  { %323 = vmatprep.subr.bf16.mxu1 %v1558_v24  ;;  %v1624_v24 = vld [vmem:[#allocation4 + $0x148] ss:$16 sps:$4 sm:$0xff]  }
  0x69   :  { %1509 = vmatpush3.bf16.msra.mxu0 %v1535_v19  ;;  %v1614_v19 = vld [vmem:[#allocation4 + $0x10c] ss:$16 sps:$4 sm:$0xff]  }
  0x6a   :  { %324 = vmatpush1.bf16.msra.mxu1 %v1560_v25  ;;  %784 = vmatprep.subr.bf16.mxu0 %v1563_v28  ;;  %v1632_v25 = vld [vmem:[#allocation4 + $0x16c] ss:$16 sps:$4 sm:$0xff]   ;;  %v1636_v28 = vld [vmem:[#allocation4 + $0x188] ss:$16 sps:$4 sm:$0xff]  }
  0x6b   :  { %827 = vmatprep.subr.bf16.mxu1 %v1566_v29  ;;  %v1641_v29 = vld [vmem:[#allocation4 + $0x1a4] ss:$16 sps:$4 sm:$0xff]  }
  0x6c   :  { %1511 = vmatmul.mubr.bf16.vlgmr.msra.gmra.mrb[0].mxu0 %v1536_v21  ;;  %v1620_v21 = vld [vmem:[#allocation4 + $0x12c] ss:$16 sps:$4 sm:$0xff]  }
  0x6d   :  { %785 = vmatpush1.bf16.msra.mxu0 %v1561_v27  ;;  %v1638_v27 = vld [vmem:[#allocation4 + $0x18c] ss:$16 sps:$4 sm:$0xff]  }
  0x6e   :  { %786 = vmatprep.subr.bf16.mxu0 %v1569_v30  ;;  %v1644_v30 = vld [vmem:[#allocation4 + $0x1ac] ss:$16 sps:$4 sm:$0xff]  }
  0x71   :  { %787 = vmatpush1.bf16.msra.mxu0 %v1567_v31  ;;  %v1639_v31 = vld [vmem:[#allocation4 + $0x1a0] ss:$16 sps:$4 sm:$0xff]  }
  0x72   :  { %788 = vmatprep.subr.bf16.mxu0 %v1575_v32  ;;  %v1642_v32 = vld [vmem:[#allocation4 + $0x1a8] ss:$16 sps:$4 sm:$0xff]  }
  0x75   :  { %789 = vmatpush1.bf16.msra.mxu0 %v1573_v33  ;;  %v1647_v33 = vld [vmem:[#allocation4 + $0x1c4] ss:$16 sps:$4 sm:$0xff]  }
  0x76   :  { %790 = vmatprep.subr.bf16.mxu0 %v1581_v34  ;;  %v1650_v34 = vld [vmem:[#allocation4 + $0x1cc] ss:$16 sps:$4 sm:$0xff]  }
  0x79   :  { %791 = vmatpush1.bf16.msra.mxu0 %v1579_v35  ;;  %v1645_v35 = vld [vmem:[#allocation4 + $0x1c0] ss:$16 sps:$4 sm:$0xff]  }
  0x7a   :  { %792 = vmatprep.subr.bf16.mxu0 %v1587_v36  ;;  %v1648_v36 = vld [vmem:[#allocation4 + $0x1c8] ss:$16 sps:$4 sm:$0xff]  }
  0x7d   :  { %793 = vmatpush1.bf16.msra.mxu0 %v1585_v37  ;;  %v1653_v37 = vld [vmem:[#allocation4 + $0x1e4] ss:$16 sps:$4 sm:$0xff]  }
  0x7e   :  { %794 = vmatprep.subr.bf16.mxu0 %v1593_v38  ;;  %v1656_v38 = vld [vmem:[#allocation4 + $0x1ec] ss:$16 sps:$4 sm:$0xff]  }
  0x81   :  { %795 = vmatpush1.bf16.msra.mxu0 %v1591_v39  ;;  %v1651_v39 = vld [vmem:[#allocation4 + $0x1e0] ss:$16 sps:$4 sm:$0xff]  }
  0x82   :  { %796 = vmatprep.subr.bf16.mxu0 %v1599_v40  ;;  %v1654_v40 = vld [vmem:[#allocation4 + $0x1e8] ss:$16 sps:$4 sm:$0xff]  }
  0x85   :  { %797 = vmatpush1.bf16.msra.mxu0 %v1597_v41  ;;  %v1657_v41 = vld [vmem:[#allocation6 + $0x40] sm:$0xff]  }
  0x86   :  { %798 = vmatprep.subr.bf16.mxu0 %v1605_v42  ;;  %v1658_v42 = vld [vmem:[#allocation6 + $0xc0] sm:$0xff]  }
  0x89   :  { %799 = vmatpush1.bf16.msra.mxu0 %v1603_v43  ;;  %v1800_v43 = vmov 1966171168  }
  0x8a   :  { %800 = vmatprep.subr.bf16.mxu0 %v1611_v44  ;;  %v365_v44 = vunpack.c.l.s4 %v1800_v43 }
  0x8d   :  { %801 = vmatpush1.bf16.msra.mxu0 %v1609_v45  ;;  %v366_v45 = vunpack.c.0.s8 %v365_v44 }
  0x8e   :  { %802 = vmatprep.subr.bf16.mxu0 %v1617_v46  ;;  %v1333_v46 = vld.sshfl [vmem:[%s1961_s4] sm:$0x11 pattern:$0x75316420] }
  0x91   :  { %803 = vmatpush1.bf16.msra.mxu0 %v1615_v47  ;;  %v1939_v47 = vsub.s32 %v366_v45, %v1926_v55 }
  0x92   :  { %804 = vmatprep.subr.bf16.mxu0 %v1623_v48  ;;  %v363_v48 = vcombine.high %v1333_v46, %v1333_v46 }
  0x95   :  { %805 = vmatpush1.bf16.msra.mxu0 %v1621_v49  ;;  %v370_v49 = vrot.slane %v1333_v46, %v1939_v47 }
  0x96   :  { %806 = vmatprep.subr.bf16.mxu0 %v1629_v50  ;;  %v377_v50 = vrot.slane %v363_v48, %v1939_v47 }
  0x99   :  { %807 = vmatpush1.bf16.msra.mxu0 %v1627_v51  ;;  %v379_v51 = vpack.i.b16 %v370_v49, %v370_v49 }
  0x9a   :  { %808 = vmatprep.subr.bf16.mxu0 %v1635_v52  ;;  %v386_v52 = vpack.i.b16 %v377_v50, %v377_v50 }
  0x9b   :  { %v384_v56 = vrot.slane %v379_v51, %v1932_v58 }
  0x9d   :  { %809 = vmatpush1.bf16.msra.mxu0 %v1633_v53 }
  0x9e   :  { %810 = vmatprep.subr.bf16.mxu0 %v1641_v29  ;;  %v1684_v29 = vld [vmem:[#allocation6 + $0xb0] sm:$0xff]  }
  0xa1   :  { %811 = vmatpush1.bf16.msra.mxu0 %v1639_v31  ;;  %v1686_v31 = vld [vmem:[#allocation6 + $0xf8] sm:$0xff]  }
  0xa2   :  { %812 = vmatprep.subr.bf16.mxu0 %v1647_v33  ;;  %v1688_v33 = vld [vmem:[#allocation6 + $0xb8] sm:$0xff]  }
  0xa5   :  { %813 = vmatpush1.bf16.msra.mxu0 %v1645_v35 }
  0xa6   :  { %814 = vmatprep.subr.bf16.mxu0 %v1653_v37 }
  0xa9   :  { %815 = vmatpush1.bf16.msra.mxu0 %v1651_v39 }
  0xaa   :  { %1450 = vmatprep.subr.bf16.mxu0 %v1657_v41 }
 0x13f   :  { %v193_v59 = vpop.f32.mrb[0].mxu0 }
 0x140   :  { %v1512_v60 = vpop.f32.mrb[1].mxu0 }
 0x141   :  { %v196_v62 = vpop.f32.mrb[2].mxu0 }
 0x142   :  { %v200_v63 = vpack.c.bf16 %v196_v62, %v193_v59  ;;  %v1513_v0 = vpop.f32.mrb[3].mxu0  ;;  %v391_v59 = vrot.slane %v386_v52, %v1932_v58 }
 0x144   :  { %v209_v1 = vadd.bf16 %v208_v61, %v200_v63 }
 0x146   :  { %vm210_vm1 = vcmp.gt.bf16.partialorder %v209_v1, 0  ;;  %v211_v2 = vmul.bf16 1045249613, %v209_v1 }
 0x148   :  { %v212_v5 = vsel %vm210_vm1, %v209_v1, %v211_v2  ;;  %v1659_v2 = vld [vmem:[#allocation6] sm:$0xff]  }
 0x149   :  { %342 = vmatmul.mubr.bf16.vlgmr.msra.gmra.mrb[0].mxu1 %v212_v5  ;;  %v1661_v5 = vld [vmem:[#allocation6 + $0x48] sm:$0xff]  }
 0x14a   :  { %828 = vmatpush1.bf16.msra.mxu1 %v1564_v3  ;;  %v1660_v3 = vld [vmem:[#allocation6 + $0x80] sm:$0xff]  }
 0x14b   :  { %829 = vmatprep.subr.bf16.mxu1 %v1572_v4 }
 0x14e   :  { %830 = vmatpush1.bf16.msra.mxu1 %v1570_v6  ;;  %v1662_v6 = vld [vmem:[#allocation6 + $0xc8] sm:$0xff]  }
 0x14f   :  { %831 = vmatprep.subr.bf16.mxu1 %v1578_v7 }
 0x152   :  { %832 = vmatpush1.bf16.msra.mxu1 %v1576_v8  ;;  %v1663_v8 = vld [vmem:[#allocation6 + $0x8] sm:$0xff]  }
 0x153   :  { %833 = vmatprep.subr.bf16.mxu1 %v1584_v9  ;;  %v1664_v9 = vld [vmem:[#allocation6 + $0x88] sm:$0xff]  }
 0x156   :  { %834 = vmatpush1.bf16.msra.mxu1 %v1582_v10  ;;  %v1665_v10 = vld [vmem:[#allocation6 + $0x50] sm:$0xff]  }
 0x157   :  { %835 = vmatprep.subr.bf16.mxu1 %v1590_v11  ;;  %v1666_v11 = vld [vmem:[#allocation6 + $0xd0] sm:$0xff]  }
 0x15a   :  { %836 = vmatpush1.bf16.msra.mxu1 %v1588_v12  ;;  %v1667_v12 = vld [vmem:[#allocation6 + $0x10] sm:$0xff]  }
 0x15b   :  { %837 = vmatprep.subr.bf16.mxu1 %v1596_v13  ;;  %v1668_v13 = vld [vmem:[#allocation6 + $0x90] sm:$0xff]  }
 0x15e   :  { %838 = vmatpush1.bf16.msra.mxu1 %v1594_v14  ;;  %v1669_v14 = vld [vmem:[#allocation6 + $0x58] sm:$0xff]  }
 0x15f   :  { %839 = vmatprep.subr.bf16.mxu1 %v1602_v15  ;;  %v1670_v15 = vld [vmem:[#allocation6 + $0xd8] sm:$0xff]  }
 0x162   :  { %840 = vmatpush1.bf16.msra.mxu1 %v1600_v16  ;;  %v1671_v16 = vld [vmem:[#allocation6 + $0x18] sm:$0xff]  }
 0x163   :  { %841 = vmatprep.subr.bf16.mxu1 %v1608_v17  ;;  %v1672_v17 = vld [vmem:[#allocation6 + $0x98] sm:$0xff]  }
 0x166   :  { %842 = vmatpush1.bf16.msra.mxu1 %v1606_v18  ;;  %v1673_v18 = vld [vmem:[#allocation6 + $0x60] sm:$0xff]  }
 0x167   :  { %843 = vmatprep.subr.bf16.mxu1 %v1614_v19  ;;  %v1674_v19 = vld [vmem:[#allocation6 + $0xe0] sm:$0xff]  }
 0x16a   :  { %844 = vmatpush1.bf16.msra.mxu1 %v1612_v20  ;;  %v1675_v20 = vld [vmem:[#allocation6 + $0x20] sm:$0xff]  }
 0x16b   :  { %845 = vmatprep.subr.bf16.mxu1 %v1620_v21  ;;  %v1676_v21 = vld [vmem:[#allocation6 + $0xa0] sm:$0xff]  }
 0x16e   :  { %846 = vmatpush1.bf16.msra.mxu1 %v1618_v22  ;;  %v1677_v22 = vld [vmem:[#allocation6 + $0x68] sm:$0xff]  }
 0x16f   :  { %847 = vmatprep.subr.bf16.mxu1 %v1626_v23  ;;  %v1678_v23 = vld [vmem:[#allocation6 + $0xe8] sm:$0xff]  }
 0x172   :  { %848 = vmatpush1.bf16.msra.mxu1 %v1624_v24  ;;  %v1679_v24 = vld [vmem:[#allocation6 + $0x28] sm:$0xff]  }
 0x173   :  { %849 = vmatprep.subr.bf16.mxu1 %v1632_v25  ;;  %v1680_v25 = vld [vmem:[#allocation6 + $0xa8] sm:$0xff]  }
 0x176   :  { %850 = vmatpush1.bf16.msra.mxu1 %v1630_v26  ;;  %v1681_v26 = vld [vmem:[#allocation6 + $0x70] sm:$0xff]  }
 0x177   :  { %851 = vmatprep.subr.bf16.mxu1 %v1638_v27  ;;  %v1682_v27 = vld [vmem:[#allocation6 + $0xf0] sm:$0xff]  }
 0x17a   :  { %852 = vmatpush1.bf16.msra.mxu1 %v1636_v28  ;;  %v1683_v28 = vld [vmem:[#allocation6 + $0x30] sm:$0xff]  }
 0x17b   :  { %853 = vmatprep.subr.bf16.mxu1 %v1644_v30  ;;  %v1685_v30 = vld [vmem:[#allocation6 + $0x78] sm:$0xff]  }
 0x17e   :  { %854 = vmatpush1.bf16.msra.mxu1 %v1642_v32  ;;  %v1687_v32 = vld [vmem:[#allocation6 + $0x38] sm:$0xff]  }
 0x17f   :  { %855 = vmatprep.subr.bf16.mxu1 %v1650_v34  ;;  %v1398_v34 = vld.sshfl [vmem:[%s1963_s6] sm:$0x33 pattern:$0x75316420] }
 0x180   :  { %v883_v35 = vcombine.high %v1398_v34, %v1398_v34 }
 0x182   :  { %856 = vmatpush1.bf16.msra.mxu1 %v1648_v36  ;;  %v890_v36 = vrot.slane %v1398_v34, %v1939_v47  ;;  %v897_v37 = vrot.slane %v883_v35, %v1939_v47 }
 0x183   :  { %857 = vmatprep.subr.bf16.mxu1 %v1656_v38 }
 0x184   :  { %v898_v38 = vcombine.high %v890_v36, %v890_v36  ;;  %v899_v39 = vcombine.high %v897_v37, %v897_v37 }
 0x186   :  { %858 = vmatpush1.bf16.msra.mxu1 %v1654_v40  ;;  %v901_v40 = vpack.i.b16 %v890_v36, %v890_v36  ;;  %v915_v41 = vpack.i.b16 %v898_v38, %v898_v38  ;;  %v922_v43 = vpack.i.b16 %v899_v39, %v899_v39 }
 0x187   :  { %1472 = vmatprep.subr.bf16.mxu1 %v1658_v42  ;;  %v908_v42 = vpack.i.b16 %v897_v37, %v897_v37 }
 0x188   :  { %v906_v49 = vrot.slane %v901_v40, %v1932_v58  ;;  %v920_v50 = vrot.slane %v915_v41, %v1932_v58  ;;  %v927_v47 = vrot.slane %v922_v43, %v1932_v58 }
 0x21c   :  { %v343_v53 = vpop.f32.mrb[0].mxu1 }
 0x21d   :  { %v345_v54 = vpop.f32.mrb[1].mxu1 }
 0x21e   :  { %v347_v57 = vpop.f32.mrb[2].mxu1 }
 0x21f   :  { %v352_v60 = vpack.c.bf16 %v347_v57, %v343_v53  ;;  %v349_v61 = vpop.f32.mrb[3].mxu1  ;;  %v913_v53 = vrot.slane %v908_v42, %v1932_v58 }
 0x220   :  { %v353_v62 = vpack.c.bf16 %v349_v61, %v345_v54 }
 0x221   :  { %v392_v63 = vadd.bf16 %v384_v56, %v352_v60 }
 0x222   :  { %v393_v55 = vadd.bf16 %v391_v59, %v353_v62 }
 0x223   :  { %v396_v0 = vmul.bf16 1045249613, %v392_v63  ;;  %vm394_vm3 = vcmp.gt.bf16.partialorder %v392_v63, 0 }
 0x224   :  { %vm395_vm2 = vcmp.gt.bf16.partialorder %v393_v55, 0  ;;  %v397_v1 = vmul.bf16 1045249613, %v393_v55 }
 0x225   :  { %v398_v7 = vsel %vm394_vm3, %v392_v63, %v396_v0 }
 0x226   :  { %v399_v4 = vsel %vm395_vm2, %v393_v55, %v397_v1 }
 0x227   :  { %816 = vmatprep.mubr.bf16.mxu0 %v399_v4  ;;  %859 = vmatprep.mubr.bf16.mxu1 %v399_v4 }
 0x228   :  { %817 = vmatmul.mubr.bf16.vlgmr.msra.gmra.mrb[4].mxu0 %v398_v7  ;;  %860 = vmatmul.mubr.bf16.vlgmr.msra.gmra.mrb[4].mxu1 %v398_v7 }
 0x229   :  { %1451 = vmatpush3.bf16.msra.mxu0 %v1659_v2  ;;  %1473 = vmatpush3.bf16.msra.mxu1 %v1660_v3 }
 0x22a   :  { %1452 = vmatprep.subr.bf16.mxu0 %v1661_v5  ;;  %1474 = vmatprep.subr.bf16.mxu1 %v1662_v6 }
 0x22d   :  { %1453 = vmatpush3.bf16.msra.mxu0 %v1663_v8  ;;  %1475 = vmatpush3.bf16.msra.mxu1 %v1664_v9 }
 0x22e   :  { %1454 = vmatprep.subr.bf16.mxu0 %v1665_v10  ;;  %1476 = vmatprep.subr.bf16.mxu1 %v1666_v11  ;;  %v1399_v10 = vld [vmem:[#allocation7] ss:$0 sm:$0xff] }
 0x231   :  { %1455 = vmatpush3.bf16.msra.mxu0 %v1667_v12  ;;  %1477 = vmatpush3.bf16.msra.mxu1 %v1668_v13 }
 0x232   :  { %1456 = vmatprep.subr.bf16.mxu0 %v1669_v14  ;;  %1478 = vmatprep.subr.bf16.mxu1 %v1670_v15 }
 0x235   :  { %1457 = vmatpush3.bf16.msra.mxu0 %v1671_v16  ;;  %1479 = vmatpush3.bf16.msra.mxu1 %v1672_v17 }
 0x236   :  { %1458 = vmatprep.subr.bf16.mxu0 %v1673_v18  ;;  %1480 = vmatprep.subr.bf16.mxu1 %v1674_v19 }
 0x239   :  { %1459 = vmatpush3.bf16.msra.mxu0 %v1675_v20  ;;  %1481 = vmatpush3.bf16.msra.mxu1 %v1676_v21 }
 0x23a   :  { %1460 = vmatprep.subr.bf16.mxu0 %v1677_v22  ;;  %1482 = vmatprep.subr.bf16.mxu1 %v1678_v23 }
 0x23d   :  { %1461 = vmatpush3.bf16.msra.mxu0 %v1679_v24  ;;  %1483 = vmatpush3.bf16.msra.mxu1 %v1680_v25 }
 0x23e   :  { %1462 = vmatprep.subr.bf16.mxu0 %v1681_v26  ;;  %1484 = vmatprep.subr.bf16.mxu1 %v1682_v27 }
 0x241   :  { %1463 = vmatpush3.bf16.msra.mxu0 %v1683_v28  ;;  %1485 = vmatpush3.bf16.msra.mxu1 %v1684_v29 }
 0x242   :  { %1464 = vmatprep.subr.bf16.mxu0 %v1685_v30  ;;  %1486 = vmatprep.subr.bf16.mxu1 %v1686_v31 }
 0x245   :  { %1465 = vmatpush3.bf16.msra.mxu0 %v1687_v32  ;;  %1487 = vmatpush3.bf16.msra.mxu1 %v1688_v33 }
 0x2fb   :  { %v818_v44 = vpop.f32.mrb[4].mxu0  ;;  %v861_v45 = vpop.f32.mrb[4].mxu1 }
 0x2fc   :  { %v820_v46 = vpop.f32.mrb[5].mxu0  ;;  %v863_v48 = vpop.f32.mrb[5].mxu1 }
 0x2fd   :  { %v822_v51 = vpop.f32.mrb[6].mxu0  ;;  %v865_v52 = vpop.f32.mrb[6].mxu1 }
 0x2fe   :  { %v870_v54 = vpack.c.bf16 %v822_v51, %v818_v44  ;;  %v872_v56 = vpack.c.bf16 %v865_v52, %v861_v45  ;;  %v824_v57 = vpop.f32.mrb[7].mxu0  ;;  %v867_v59 = vpop.f32.mrb[7].mxu1 }
 0x2ff   :  { %v871_v60 = vpack.c.bf16 %v824_v57, %v820_v46  ;;  %v873_v61 = vpack.c.bf16 %v867_v59, %v863_v48 }
 0x300   :  { %v928_v62 = vadd.bf16 %v906_v49, %v870_v54  ;;  %v930_v63 = vadd.bf16 %v920_v50, %v872_v56 }
 0x301   :  { %v929_v55 = vadd.bf16 %v913_v53, %v871_v60  ;;  %v931_v0 = vadd.bf16 %v927_v47, %v873_v61 }
 0x302   :  { %v936_v1 = vmul.bf16 1045249613, %v928_v62  ;;  %v938_v2 = vmul.bf16 1045249613, %v930_v63  ;;  %vm932_vm4 = vcmp.gt.bf16.partialorder %v928_v62, 0  ;;  %vm934_vm5 = vcmp.gt.bf16.partialorder %v930_v63, 0 }
 0x303   :  { %vm933_vm6 = vcmp.gt.bf16.partialorder %v929_v55, 0  ;;  %v937_v3 = vmul.bf16 1045249613, %v929_v55  ;;  %vm935_vm7 = vcmp.gt.bf16.partialorder %v931_v0, 0  ;;  %v939_v4 = vmul.bf16 1045249613, %v931_v0 }
 0x304   :  { %v940_v6 = vsel %vm932_vm4, %v928_v62, %v936_v1  ;;  %v942_v7 = vsel %vm934_vm5, %v930_v63, %v938_v2 }
 0x305   :  { %v941_v5 = vsel %vm933_vm6, %v929_v55, %v937_v3  ;;  %v943_v58 = vsel %vm935_vm7, %v931_v0, %v939_v4 }
 0x306   :  { %1239 = vmatprep.mubr.bf16.mxu0 %v941_v5  ;;  %1280 = vmatprep.mubr.bf16.mxu1 %v943_v58 }
 0x307   :  { %1240 = vmatmul.mubr.bf16.vlgmr.msra.gmra.mrb[8].mxu0 %v940_v6  ;;  %1281 = vmatmul.mubr.bf16.vlgmr.msra.gmra.mrb[8].mxu1 %v942_v7 }
 0x3da   :  { %v1466_v8 = vpop.f32.mrb[8].mxu0  ;;  %v1488_v9 = vpop.f32.mrb[8].mxu1 }
 0x3db   :  { %v1467_v11 = vpop.f32.mrb[9].mxu0  ;;  %v1489_v12 = vpop.f32.mrb[9].mxu1 }
 0x3dc   :  { %v1468_v13 = vadd.f32 %v1467_v11, %v1466_v8  ;;  %v1490_v14 = vadd.f32 %v1489_v12, %v1488_v9  ;;  %v1469_v15 = vpop.f32.mrb[10].mxu0  ;;  %v1491_v16 = vpop.f32.mrb[10].mxu1 }
 0x3dd   :  { %v1470_v17 = vpop.f32.mrb[11].mxu0  ;;  %v1492_v18 = vpop.f32.mrb[11].mxu1 }
 0x3de   :  { %v1242_v19 = vadd.f32 %v1468_v13, %v1399_v10  ;;  %v1471_v20 = vadd.f32 %v1470_v17, %v1469_v15  ;;  %v1493_v21 = vadd.f32 %v1492_v18, %v1491_v16 }
 0x3e0   :  { %v1283_v22 = vadd.f32 %v1490_v14, %v1242_v19  ;;  %v1245_v23 = vadd.f32 %v1471_v20, %v1399_v10 }
 0x3e2   :  { %v1286_v24 = vadd.f32 %v1493_v21, %v1245_v23  ;;  %1689 = vtanh.f32 %v1283_v22 }
 0x3e4   :  { %1691 = vtanh.f32 %v1286_v24 }
 0x3ec   :  { %v1690_v25 = vpop.eup %1689 }
 0x3ee   :  { %v1692_v26 = vpop.eup %1691 }
 0x3ef   :  { %v1439_v27 = vpack.c.bf16 %v1692_v26, %v1690_v25 }
 0x3f1   :  { %1440 = vst [vmem:[%s1966_s9] sm:$0xff] %v1439_v27  }
 0x3f2   :  { %1305 = vsyncpa [#allocation3], 1 }
 0x3f3   :  { %1306 = vsyncpa [#allocation5], 1 }
 0x3f4   :  { %1307 = vsyncpa [#allocation8], 1 }

</bundles_post_ra>
